<compile_context>
chip_gen: v6e
topology: v6e:2x2x1
jax: 0.10.0
libtpu: 0.0.40
codegen_flags: <defaults>
</compile_context>

<pallas_src>
import functools

import jax
import jax.numpy as jnp
from jax import lax
from jax.experimental import pallas as pl
from jax.experimental.pallas import tpu as pltpu


# ---------------------------------------------------------------------------
# Kernels
# ---------------------------------------------------------------------------

def _layernorm_rows(x, gamma, beta, eps):
    """LayerNorm over the last dim of a (rows, E) f32 array (torch eps=1e-5)."""
    mu = jnp.mean(x, axis=-1, keepdims=True)
    xc = x - mu
    var = jnp.mean(xc * xc, axis=-1, keepdims=True)
    return xc * lax.rsqrt(var + eps) * gamma + beta


def mapper_prefix_kernel(x_ref, w_ref, b_ref, pref_ref, o_ref, *,
                         clip_length, t_valid):
    """out[:, :CL] = (x @ W + b).view(B, CL, E); out[:, CL:CL+P] = prefix_const;
    out[:, t_valid:] = 0 (seq padding)."""
    bsz = x_ref.shape[0]
    p, e = pref_ref.shape
    t_pad = o_ref.shape[1]
    # One fused MXU matmul with N = CL*E instead of CL tiny matmuls.
    y = jnp.dot(x_ref[...], w_ref[...], preferred_element_type=jnp.float32) + b_ref[...]
    for c in range(clip_length):                       # small, static -> unrolled stores
        o_ref[:, c, :] = y[:, c * e:(c + 1) * e]
    o_ref[:, clip_length:t_valid, :] = jnp.broadcast_to(pref_ref[...][None], (bsz, p, e))
    if t_valid < t_pad:
        o_ref[:, t_valid:, :] = jnp.zeros((bsz, t_pad - t_valid, e), jnp.float32)


def fused_layers_kernel(
    x_ref, ln1g_ref, ln1b_ref, wqkv_ref, wp_ref, bp_ref,
    ln2g_ref, ln2b_ref, w1_ref, b1_ref, w2_ref, b2_ref, o_ref,
    *, num_heads, t_valid, eps, matmul_dtype, approx_recip,
):
    """One transformer layer per grid step along axis 1; the activation is carried
    in the resident output block (same block index across the layer axis)."""
    bt, t, e = x_ref.shape
    rows = bt * t
    hd = e // num_heads
    md = matmul_dtype

    layer = pl.program_id(1)

    @pl.when(layer == 0)
    def _():
        o_ref[...] = x_ref[...]

    x2 = o_ref[...].astype(jnp.float32).reshape(rows, e)        # residual stream (f32)

    # ----- LayerNorm 1 (folded rows) ----------------------------------------
    h = _layernorm_rows(x2, ln1g_ref[0], ln1b_ref[0], eps)

    # ----- fused QKV projection: one (rows, E) x (E, 3E) MXU matmul ---------
    # (softmax scale is pre-folded into the Wq columns; QKV has no bias.)
    qkv = jnp.dot(h.astype(md), wqkv_ref[0], preferred_element_type=jnp.float32)

    if t_valid < t:
        key_mask = lax.broadcasted_iota(jnp.int32, (bt, t, t), 2) < t_valid
    else:
        key_mask = None

    # ----- per-head scores / softmax / context (tiny matmuls, unrolled) -----
    ctx_parts = []
    for hh in range(num_heads):
        q_h = qkv[:, hh * hd:(hh + 1) * hd].astype(md).reshape(bt, t, hd)
        k_h = qkv[:, e + hh * hd:e + (hh + 1) * hd].astype(md).reshape(bt, t, hd)
        v_h = qkv[:, 2 * e + hh * hd:2 * e + (hh + 1) * hd].astype(md).reshape(bt, t, hd)
        s = jnp.einsum('bnd,bmd->bnm', q_h, k_h,
                       preferred_element_type=jnp.float32)              # (bt, T, T)
        if key_mask is not None:
            s = jnp.where(key_mask, s, -1e30)                           # mask padded keys
        s = s - jnp.max(s, axis=-1, keepdims=True)
        p = jnp.exp(s)
        p = p * pl.reciprocal(jnp.sum(p, axis=-1, keepdims=True), approx=approx_recip)
        ctx_h = jnp.einsum('bnm,bmd->bnd', p.astype(md), v_h,
                           preferred_element_type=jnp.float32)          # (bt, T, hd)
        ctx_parts.append(ctx_h.reshape(rows, hd))

    # heads concatenated on the lane axis (torch head order) -> one Wp matmul.
    ctx = jnp.concatenate(ctx_parts, axis=-1)                           # (rows, E)
    attn_out = jnp.dot(ctx.astype(md), wp_ref[0],
                       preferred_element_type=jnp.float32) + bp_ref[0]

    x2 = x2 + attn_out                                                  # residual 1

    # ----- LayerNorm 2 + MLP (folded rows) -----------------------------------
    h2 = _layernorm_rows(x2, ln2g_ref[0], ln2b_ref[0], eps)
    z = jnp.dot(h2.astype(md), w1_ref[0], preferred_element_type=jnp.float32) + b1_ref[0]
    z = jnp.maximum(z, 0.0)                                             # ReLU
    # nn.Dropout(p=0.0) in the reference module is the identity.
    mlp = jnp.dot(z.astype(md), w2_ref[0], preferred_element_type=jnp.float32) + b2_ref[0]

    x2 = x2 + mlp                                                       # residual 2
    o_ref[...] = x2.reshape(bt, t, e).astype(o_ref.dtype)

    # TODO(synk): the optional user-supplied attention `mask` (masked_fill with -inf)
    # is not implemented; TransformerMapper.forward always calls with mask=None.


# ---------------------------------------------------------------------------
# Wrappers
# ---------------------------------------------------------------------------

def _pick_batch_tile(batch, seq, row_target=512):
    """Largest batch tile with folded rows (bt*seq = the matmul M dim) <= row_target.
    Bigger tiles fill the 256-wide MXU (v6e/v7x) and amortize the ~0.35us/step grid
    overhead; VMEM pressure is handled via vmem_limit_bytes."""
    best = 1
    for d in range(1, batch + 1):
        if batch % d == 0 and d * seq <= row_target:
            best = d
    return best


def _vmem_limit_bytes():
    """Scoped-VMEM budget: ~3/4 of physical (v5e/v6e: 96 MiB of 128; v7x: 48 of 64)."""
    try:
        return int(pltpu.get_tpu_info().vmem_capacity_bytes * 3 // 4)
    except Exception:
        return 48 * 1024 * 1024


def build_prefix(x_clip, mapper_params, *, clip_length):
    w = mapper_params['w_clip']            # (dim_clip, CL*E)
    bvec = mapper_params['b_clip']         # (1, CL*E)
    pref = mapper_params['prefix_const']   # (P, E)
    bsz, dc = x_clip.shape
    cle = w.shape[1]
    p, e = pref.shape
    t_valid = clip_length + p
    t_pad = -(-t_valid // 8) * 8           # pad seq to a multiple of 8 (sublane)

    kernel = functools.partial(mapper_prefix_kernel,
                               clip_length=clip_length, t_valid=t_valid)
    return pl.pallas_call(
        kernel,
        out_shape=jax.ShapeDtypeStruct((bsz, t_pad, e), jnp.float32),
        grid_spec=pltpu.PrefetchScalarGridSpec(
            num_scalar_prefetch=0,
            grid=(1,),
            in_specs=[
                pl.BlockSpec((bsz, dc), lambda i: (0, 0)),
                pl.BlockSpec((dc, cle), lambda i: (0, 0)),
                pl.BlockSpec((1, cle), lambda i: (0, 0)),
                pl.BlockSpec((p, e), lambda i: (0, 0)),
            ],
            out_specs=pl.BlockSpec((bsz, t_pad, e), lambda i: (0, 0, 0)),
        ),
        compiler_params=pltpu.CompilerParams(dimension_semantics=("arbitrary",)),
    )(x_clip, w, bvec, pref)


def run_transformer(x, layers, *, num_heads, t_valid, matmul_dtype=jnp.bfloat16,
                    approx_recip=True, batch_tile=None):
    b, t, e = x.shape
    num_layers = layers['wqkv'].shape[0]
    hm = layers['w1'].shape[-1]
    bt = batch_tile if batch_tile is not None else _pick_batch_tile(b, t)
    assert b % bt == 0

    kernel = functools.partial(
        fused_layers_kernel, num_heads=num_heads, t_valid=t_valid, eps=1e-5,
        matmul_dtype=matmul_dtype, approx_recip=approx_recip)

    def wspec(a, c):                        # per-layer stacked weight: indexed by layer
        return pl.BlockSpec((1, a, c), lambda bi, li: (li, 0, 0))

    act_spec = pl.BlockSpec((bt, t, e), lambda bi, li: (bi, 0, 0))

    return pl.pallas_call(
        kernel,
        out_shape=jax.ShapeDtypeStruct((b, t, e), jnp.float32),
        grid_spec=pltpu.PrefetchScalarGridSpec(
            num_scalar_prefetch=0,
            grid=(b // bt, num_layers),
            in_specs=[
                act_spec,                                   # x (only consumed at layer 0)
                wspec(1, e), wspec(1, e),                   # ln1 gamma / beta
                wspec(e, 3 * e),                            # fused [Wq*scale | Wk | Wv]
                wspec(e, e),                                # Wp
                wspec(1, e),                                # project bias
                wspec(1, e), wspec(1, e),                   # ln2 gamma / beta
                wspec(e, hm), wspec(1, hm),                 # fc1
                wspec(hm, e), wspec(1, e),                  # fc2
            ],
            out_specs=act_spec,
        ),
        compiler_params=pltpu.CompilerParams(
            dimension_semantics=("parallel", "arbitrary"),
            vmem_limit_bytes=_vmem_limit_bytes()),
    )(x, layers['ln1_g'], layers['ln1_b'], layers['wqkv'], layers['wp'],
      layers['bp'], layers['ln2_g'], layers['ln2_b'], layers['w1'],
      layers['b1'], layers['w2'], layers['b2'])


def transformer_mapper_forward(x_clip, params, *, num_heads, clip_length,
                               matmul_dtype=jnp.bfloat16, approx_recip=True,
                               batch_tile=None):
    prefix_length = params['mapper']['prefix_const'].shape[0]
    t_valid = clip_length + prefix_length
    h = build_prefix(x_clip, params['mapper'], clip_length=clip_length)
    h = run_transformer(h, params['layers'], num_heads=num_heads, t_valid=t_valid,
                        matmul_dtype=matmul_dtype, approx_recip=approx_recip,
                        batch_tile=batch_tile)
    return h[:, clip_length:t_valid]


# ---------------------------------------------------------------------------
# Parameter preparation (PyTorch layout -> kernel layout)
# ---------------------------------------------------------------------------

def prepare_params(raw, *, num_heads, matmul_dtype=jnp.bfloat16):
    """PyTorch (out,in) Linear weights -> (in,out); [Wq*scale | Wk | Wv] fused into one
    (E, 3E) weight per layer; all per-layer tensors stacked on a leading layer axis;
    matmul weights cast to matmul_dtype (bf16 on all TPU generations), biases/LN f32."""
    e = raw['prefix_const'].shape[1]
    hd = e // num_heads
    scale = hd ** (-0.5)

    mapper = dict(
        w_clip=jnp.transpose(raw['linear_w']),          # (dim_clip, CL*E)
        b_clip=raw['linear_b'].reshape(1, -1),          # (1, CL*E)
        prefix_const=raw['prefix_const'],               # (P, E)
    )

    def stack(fn):
        return jnp.stack([fn(lr) for lr in raw['layers']], axis=0)

    layers = dict(
        ln1_g=stack(lambda lr: lr['ln1_g'].reshape(1, e)),
        ln1_b=stack(lambda lr: lr['ln1_b'].reshape(1, e)),
        # columns: [q (all heads) | k (all heads) | v (all heads)], scale folded into q.
        wqkv=stack(lambda lr: jnp.concatenate(
            [jnp.transpose(lr['wq']) * scale, jnp.transpose(lr['wkv'])], axis=1)
        ).astype(matmul_dtype),                          # (L, E, 3E)
        wp=stack(lambda lr: jnp.transpose(lr['wp'])).astype(matmul_dtype),   # (L, E, E)
        bp=stack(lambda lr: lr['bp'].reshape(1, e)),
        ln2_g=stack(lambda lr: lr['ln2_g'].reshape(1, e)),
        ln2_b=stack(lambda lr: lr['ln2_b'].reshape(1, e)),
        w1=stack(lambda lr: jnp.transpose(lr['w1'])).astype(matmul_dtype),   # (L, E, Hm)
        b1=stack(lambda lr: lr['b1'].reshape(1, -1)),
        w2=stack(lambda lr: jnp.transpose(lr['w2'])).astype(matmul_dtype),   # (L, Hm, E)
        b2=stack(lambda lr: lr['b2'].reshape(1, e)),
    )
    return dict(mapper=mapper, layers=layers)


# ---------------------------------------------------------------------------
# Pure-JAX reference (mirrors the PyTorch module exactly)
# ---------------------------------------------------------------------------

def _reference_layer(x, lr, num_heads):
    b, n, c = x.shape
    hd = c // num_heads
    scale = hd ** (-0.5)

    def ln(v, g, bta):
        mu = v.mean(-1, keepdims=True)
        var = ((v - mu) ** 2).mean(-1, keepdims=True)
        return (v - mu) / jnp.sqrt(var + 1e-5) * g + bta

    h1 = ln(x, lr['ln1_g'], lr['ln1_b'])
    q = (h1 @ lr['wq'].T).reshape(b, n, num_heads, hd)
    kv = (h1 @ lr['wkv'].T).reshape(b, n, 2, num_heads, hd)
    k, v = kv[:, :, 0], kv[:, :, 1]
    att = jnp.einsum('bnhd,bmhd->bnmh', q, k) * scale
    att = jax.nn.softmax(att, axis=2)
    out = jnp.einsum('bnmh,bmhd->bnhd', att, v).reshape(b, n, c)
    out = out @ lr['wp'].T + lr['bp']
    x = x + out
    h2 = ln(x, lr['ln2_g'], lr['ln2_b'])
    z = jnp.maximum(h2 @ lr['w1'].T + lr['b1'], 0.0)
    x = x + (z @ lr['w2'].T + lr['b2'])
    return x


def reference_forward(x_clip, raw, *, num_heads, clip_length):
    e = raw['prefix_const'].shape[1]
    b = x_clip.shape[0]
    y = x_clip @ raw['linear_w'].T + raw['linear_b']
    pre = y.reshape(b, clip_length, e)
    prefix = jnp.concatenate(
        [pre, jnp.broadcast_to(raw['prefix_const'][None],
                               (b,) + raw['prefix_const'].shape)], axis=1)
    h = prefix
    for lr in raw['layers']:
        h = _reference_layer(h, lr, num_heads)
    return h[:, clip_length:]


# ---------------------------------------------------------------------------
# Test
# ---------------------------------------------------------------------------

if __name__ == "__main__":
    # Small shapes consistent with TransformerMapper (8 heads fixed by the module):
    batch = 2
    dim_clip = 32
    dim_embedding = 64           # head_dim = 8
    clip_length = 8
    prefix_length = 8            # T = clip_length + prefix_length = 16
    num_layers = 2
    num_heads = 8
    mlp_hidden = int(dim_embedding * 2.0)     # Transformer default mlp_ratio = 2.0

    key = jax.random.PRNGKey(0)
    k_iter = iter(jax.random.split(key, 8 + 12 * num_layers))
    nrm = lambda shape, s: s * jax.random.normal(next(k_iter), shape, dtype=jnp.float32)

    raw = dict(
        linear_w=nrm((clip_length * dim_embedding, dim_clip), dim_clip ** -0.5),
        linear_b=nrm((clip_length * dim_embedding,), 0.02),
        prefix_const=nrm((prefix_length, dim_embedding), 1.0),
        layers=[],
    )
    for _ in range(num_layers):
        raw['layers'].append(dict(
            ln1_g=1.0 + nrm((dim_embedding,), 0.05), ln1_b=nrm((dim_embedding,), 0.05),
            wq=nrm((dim_embedding, dim_embedding), dim_embedding ** -0.5),
            wkv=nrm((2 * dim_embedding, dim_embedding), dim_embedding ** -0.5),
            wp=nrm((dim_embedding, dim_embedding), dim_embedding ** -0.5),
            bp=nrm((dim_embedding,), 0.02),
            ln2_g=1.0 + nrm((dim_embedding,), 0.05), ln2_b=nrm((dim_embedding,), 0.05),
            w1=nrm((mlp_hidden, dim_embedding), dim_embedding ** -0.5),
            b1=nrm((mlp_hidden,), 0.02),
            w2=nrm((dim_embedding, mlp_hidden), mlp_hidden ** -0.5),
            b2=nrm((dim_embedding,), 0.02),
        ))

    x_clip = nrm((batch, dim_clip), 1.0)

    ref = jax.block_until_ready(
        reference_forward(x_clip, raw, num_heads=num_heads, clip_length=clip_length))

    # 1) f32 MXU operands + exact softmax reciprocal (numerical check).
    params_f32 = prepare_params(raw, num_heads=num_heads, matmul_dtype=jnp.float32)
    out_f32 = transformer_mapper_forward(
        x_clip, params_f32, num_heads=num_heads, clip_length=clip_length,
        matmul_dtype=jnp.float32, approx_recip=False)
    out_f32 = jax.block_until_ready(out_f32)
    assert out_f32.shape == (batch, prefix_length, dim_embedding)
    assert bool(jnp.all(jnp.isfinite(out_f32)))
    assert jnp.allclose(out_f32, ref, atol=5e-2, rtol=5e-2), \
        float(jnp.max(jnp.abs(out_f32 - ref)))

    # 2) optimized path: bf16 MXU operands + approx EUP reciprocal.
    params_bf16 = prepare_params(raw, num_heads=num_heads, matmul_dtype=jnp.bfloat16)
    out_bf16 = transformer_mapper_forward(
        x_clip, params_bf16, num_heads=num_heads, clip_length=clip_length,
        matmul_dtype=jnp.bfloat16, approx_recip=True)
    out_bf16 = jax.block_until_ready(out_bf16)
    assert bool(jnp.all(jnp.isfinite(out_bf16)))
    assert jnp.allclose(out_bf16, ref, atol=1.5e-1, rtol=1e-1), \
        float(jnp.max(jnp.abs(out_bf16 - ref)))

    print("KERNEL_OK")
</pallas_src>

<mosaic_0001>
module attributes {stable_mosaic.version = 11 : i64} {
  func.func @mapper_prefix_kernel(%arg0: i32, %arg1: memref<2x32xf32, #tpu.memory_space<vmem>>, %arg2: memref<32x512xf32, #tpu.memory_space<vmem>>, %arg3: memref<1x512xf32, #tpu.memory_space<vmem>>, %arg4: memref<8x64xf32, #tpu.memory_space<vmem>>, %arg5: memref<2x16x64xf32, #tpu.memory_space<vmem>>) attributes {dimension_semantics = [#tpu.dimension_semantics<arbitrary>], iteration_bounds = array<i64: 1>, scalar_prefetch = 0 : i64, scratch_operands = 0 : i64, tpu.core_type = #tpu.core_type<tc>, window_params = [{pipeline_mode = #tpu.pipeline_mode<synchronous>, transform_indices = @transform_0, window_bounds = array<i64: 2, 32>}, {pipeline_mode = #tpu.pipeline_mode<synchronous>, transform_indices = @transform_1, window_bounds = array<i64: 32, 512>}, {pipeline_mode = #tpu.pipeline_mode<synchronous>, transform_indices = @transform_2, window_bounds = array<i64: 1, 512>}, {pipeline_mode = #tpu.pipeline_mode<synchronous>, transform_indices = @transform_3, window_bounds = array<i64: 8, 64>}, {pipeline_mode = #tpu.pipeline_mode<synchronous>, transform_indices = @transform_4, window_bounds = array<i64: 2, 16, 64>}]} {
    %c0 = arith.constant 0 : index
    %c0_0 = arith.constant 0 : index
    %0 = vector.load %arg1[%c0, %c0_0] : memref<2x32xf32, #tpu.memory_space<vmem>>, vector<2x32xf32>
    %c0_1 = arith.constant 0 : index
    %c0_2 = arith.constant 0 : index
    %1 = vector.load %arg2[%c0_1, %c0_2] : memref<32x512xf32, #tpu.memory_space<vmem>>, vector<32x512xf32>
    %cst = arith.constant dense<0.000000e+00> : vector<2x512xf32>
    %2 = tpu.matmul %0, %1, %cst {dimension_numbers = #tpu.dot_dimension_numbers<[1], [0], [0], [1], [0, 0, 1, 1], [], []>} : vector<2x32xf32>, vector<32x512xf32>, vector<2x512xf32> -> vector<2x512xf32>
    %c0_3 = arith.constant 0 : index
    %c0_4 = arith.constant 0 : index
    %3 = vector.load %arg3[%c0_3, %c0_4] : memref<1x512xf32, #tpu.memory_space<vmem>>, vector<1x512xf32>
    %4 = vector.broadcast %3 : vector<1x512xf32> to vector<2x512xf32>
    %5 = arith.addf %2, %4 : vector<2x512xf32>
    %6 = vector.extract_strided_slice %5 {offsets = [0, 0], sizes = [2, 64], strides = [1, 1]} : vector<2x512xf32> to vector<2x64xf32>
    %c0_5 = arith.constant 0 : index
    %c0_6 = arith.constant 0 : index
    %c0_7 = arith.constant 0 : index
    %7 = vector.load %arg5[%c0_5, %c0_6, %c0_7] : memref<2x16x64xf32, #tpu.memory_space<vmem>>, vector<2x1x64xf32>
    %8 = vector.shape_cast %7 : vector<2x1x64xf32> to vector<2x64xf32>
    %9 = vector.shape_cast %6 : vector<2x64xf32> to vector<2x1x64xf32>
    tpu.vector_store %arg5[%c0_5, %c0_6, %c0_7], %9 {strides = array<i32>} : memref<2x16x64xf32, #tpu.memory_space<vmem>>, vector<2x1x64xf32>,
    %10 = vector.extract_strided_slice %5 {offsets = [0, 64], sizes = [2, 64], strides = [1, 1]} : vector<2x512xf32> to vector<2x64xf32>
    %c0_8 = arith.constant 0 : index
    %c1 = arith.constant 1 : index
    %c0_9 = arith.constant 0 : index
    %11 = vector.load %arg5[%c0_8, %c1, %c0_9] : memref<2x16x64xf32, #tpu.memory_space<vmem>>, vector<2x1x64xf32>
    %12 = vector.shape_cast %11 : vector<2x1x64xf32> to vector<2x64xf32>
    %13 = vector.shape_cast %10 : vector<2x64xf32> to vector<2x1x64xf32>
    tpu.vector_store %arg5[%c0_8, %c1, %c0_9], %13 {strides = array<i32>} : memref<2x16x64xf32, #tpu.memory_space<vmem>>, vector<2x1x64xf32>,
    %14 = vector.extract_strided_slice %5 {offsets = [0, 128], sizes = [2, 64], strides = [1, 1]} : vector<2x512xf32> to vector<2x64xf32>
    %c0_10 = arith.constant 0 : index
    %c2 = arith.constant 2 : index
    %c0_11 = arith.constant 0 : index
    %15 = vector.load %arg5[%c0_10, %c2, %c0_11] : memref<2x16x64xf32, #tpu.memory_space<vmem>>, vector<2x1x64xf32>
    %16 = vector.shape_cast %15 : vector<2x1x64xf32> to vector<2x64xf32>
    %17 = vector.shape_cast %14 : vector<2x64xf32> to vector<2x1x64xf32>
    tpu.vector_store %arg5[%c0_10, %c2, %c0_11], %17 {strides = array<i32>} : memref<2x16x64xf32, #tpu.memory_space<vmem>>, vector<2x1x64xf32>,
    %18 = vector.extract_strided_slice %5 {offsets = [0, 192], sizes = [2, 64], strides = [1, 1]} : vector<2x512xf32> to vector<2x64xf32>
    %c0_12 = arith.constant 0 : index
    %c3 = arith.constant 3 : index
    %c0_13 = arith.constant 0 : index
    %19 = vector.load %arg5[%c0_12, %c3, %c0_13] : memref<2x16x64xf32, #tpu.memory_space<vmem>>, vector<2x1x64xf32>
    %20 = vector.shape_cast %19 : vector<2x1x64xf32> to vector<2x64xf32>
    %21 = vector.shape_cast %18 : vector<2x64xf32> to vector<2x1x64xf32>
    tpu.vector_store %arg5[%c0_12, %c3, %c0_13], %21 {strides = array<i32>} : memref<2x16x64xf32, #tpu.memory_space<vmem>>, vector<2x1x64xf32>,
    %22 = vector.extract_strided_slice %5 {offsets = [0, 256], sizes = [2, 64], strides = [1, 1]} : vector<2x512xf32> to vector<2x64xf32>
    %c0_14 = arith.constant 0 : index
    %c4 = arith.constant 4 : index
    %c0_15 = arith.constant 0 : index
    %23 = vector.load %arg5[%c0_14, %c4, %c0_15] : memref<2x16x64xf32, #tpu.memory_space<vmem>>, vector<2x1x64xf32>
    %24 = vector.shape_cast %23 : vector<2x1x64xf32> to vector<2x64xf32>
    %25 = vector.shape_cast %22 : vector<2x64xf32> to vector<2x1x64xf32>
    tpu.vector_store %arg5[%c0_14, %c4, %c0_15], %25 {strides = array<i32>} : memref<2x16x64xf32, #tpu.memory_space<vmem>>, vector<2x1x64xf32>,
    %26 = vector.extract_strided_slice %5 {offsets = [0, 320], sizes = [2, 64], strides = [1, 1]} : vector<2x512xf32> to vector<2x64xf32>
    %c0_16 = arith.constant 0 : index
    %c5 = arith.constant 5 : index
    %c0_17 = arith.constant 0 : index
    %27 = vector.load %arg5[%c0_16, %c5, %c0_17] : memref<2x16x64xf32, #tpu.memory_space<vmem>>, vector<2x1x64xf32>
    %28 = vector.shape_cast %27 : vector<2x1x64xf32> to vector<2x64xf32>
    %29 = vector.shape_cast %26 : vector<2x64xf32> to vector<2x1x64xf32>
    tpu.vector_store %arg5[%c0_16, %c5, %c0_17], %29 {strides = array<i32>} : memref<2x16x64xf32, #tpu.memory_space<vmem>>, vector<2x1x64xf32>,
    %30 = vector.extract_strided_slice %5 {offsets = [0, 384], sizes = [2, 64], strides = [1, 1]} : vector<2x512xf32> to vector<2x64xf32>
    %c0_18 = arith.constant 0 : index
    %c6 = arith.constant 6 : index
    %c0_19 = arith.constant 0 : index
    %31 = vector.load %arg5[%c0_18, %c6, %c0_19] : memref<2x16x64xf32, #tpu.memory_space<vmem>>, vector<2x1x64xf32>
    %32 = vector.shape_cast %31 : vector<2x1x64xf32> to vector<2x64xf32>
    %33 = vector.shape_cast %30 : vector<2x64xf32> to vector<2x1x64xf32>
    tpu.vector_store %arg5[%c0_18, %c6, %c0_19], %33 {strides = array<i32>} : memref<2x16x64xf32, #tpu.memory_space<vmem>>, vector<2x1x64xf32>,
    %34 = vector.extract_strided_slice %5 {offsets = [0, 448], sizes = [2, 64], strides = [1, 1]} : vector<2x512xf32> to vector<2x64xf32>
    %c0_20 = arith.constant 0 : index
    %c7 = arith.constant 7 : index
    %c0_21 = arith.constant 0 : index
    %35 = vector.load %arg5[%c0_20, %c7, %c0_21] : memref<2x16x64xf32, #tpu.memory_space<vmem>>, vector<2x1x64xf32>
    %36 = vector.shape_cast %35 : vector<2x1x64xf32> to vector<2x64xf32>
    %37 = vector.shape_cast %34 : vector<2x64xf32> to vector<2x1x64xf32>
    tpu.vector_store %arg5[%c0_20, %c7, %c0_21], %37 {strides = array<i32>} : memref<2x16x64xf32, #tpu.memory_space<vmem>>, vector<2x1x64xf32>,
    %c0_22 = arith.constant 0 : index
    %c0_23 = arith.constant 0 : index
    %38 = vector.load %arg4[%c0_22, %c0_23] : memref<8x64xf32, #tpu.memory_space<vmem>>, vector<8x64xf32>
    %39 = vector.shape_cast %38 : vector<8x64xf32> to vector<1x8x64xf32>
    %40 = vector.shape_cast %39 : vector<1x8x64xf32> to vector<1x8x64xf32>
    %41 = vector.broadcast %40 : vector<1x8x64xf32> to vector<2x8x64xf32>
    %c0_24 = arith.constant 0 : index
    %c8 = arith.constant 8 : index
    %c0_25 = arith.constant 0 : index
    %42 = vector.load %arg5[%c0_24, %c8, %c0_25] : memref<2x16x64xf32, #tpu.memory_space<vmem>>, vector<2x8x64xf32>
    tpu.vector_store %arg5[%c0_24, %c8, %c0_25], %41 {strides = array<i32>} : memref<2x16x64xf32, #tpu.memory_space<vmem>>, vector<2x8x64xf32>,
    return
  }
  func.func @transform_0(%arg0: i32) -> (i32, i32) {
    %c0_i32 = arith.constant 0 : i32
    %c0_i32_0 = arith.constant 0 : i32
    %c0_i32_1 = arith.constant 0 : i32
    return %c0_i32, %c0_i32_0 : i32, i32
  }
  func.func @transform_1(%arg0: i32) -> (i32, i32) {
    %c0_i32 = arith.constant 0 : i32
    %c0_i32_0 = arith.constant 0 : i32
    %c0_i32_1 = arith.constant 0 : i32
    return %c0_i32, %c0_i32_0 : i32, i32
  }
  func.func @transform_2(%arg0: i32) -> (i32, i32) {
    %c0_i32 = arith.constant 0 : i32
    %c0_i32_0 = arith.constant 0 : i32
    %c0_i32_1 = arith.constant 0 : i32
    return %c0_i32, %c0_i32_0 : i32, i32
  }
  func.func @transform_3(%arg0: i32) -> (i32, i32) {
    %c0_i32 = arith.constant 0 : i32
    %c0_i32_0 = arith.constant 0 : i32
    %c0_i32_1 = arith.constant 0 : i32
    return %c0_i32, %c0_i32_0 : i32, i32
  }
  func.func @transform_4(%arg0: i32) -> (i32, i32, i32) {
    %c0_i32 = arith.constant 0 : i32
    %c0_i32_0 = arith.constant 0 : i32
    %c0_i32_1 = arith.constant 0 : i32
    %c0_i32_2 = arith.constant 0 : i32
    return %c0_i32, %c0_i32_0, %c0_i32_1 : i32, i32, i32
  }
}

</mosaic_0001>

<bundles_post_ra>
// kernel: tpu_custom_call.1
= control target key start
LH: loop header
LB: loop body
LE: loop exit
PB: predicated region body
PF: predicated region fallthrough
CT: control target
= control target key end

     0   :  { %9 = vsyncpa [#allocation3], 0  ;;  %s649_s0 = inlined_call_operand.hbm [shape: f32[2,32], index: 0, kind: input, shape index: {}]   ;;  %s650_s1 = inlined_call_operand.hbm [shape: f32[32,512], index: 1, kind: input, shape index: {}]   ;;  %s651_s2 = inlined_call_operand.hbm [shape: f32[1,512], index: 2, kind: input, shape index: {}]   ;;  %s652_s3 = inlined_call_operand.hbm [shape: f32[8,64], index: 3, kind: input, shape index: {}]   ;;  %s653_s4 = inlined_call_operand.hbm [shape: f32[2,16,64], index: 4, kind: output, shape index: {}]  }
   0x1   :  { %10 = vsyncpa [#allocation6], 0 }
   0x2   :  { %11 = vsyncpa [#allocation9], 0 }
   0x3   :  { %12 = vsyncpa [#allocation4], 0  ;;  %s570_s15 = smov [#allocation5]  }
   0x4   :  { %s28_s16 = sshll.u32 %s570_s15, 4  ;;  %s29_s16 = int_to_ptr.vmem [resolvable:$true] %s28_s16 }
   0x5   :  { %s470_s17 = scalar_lea.vmem %s29_s16, 2048  ;;  %p475_p1 = scmp.lt.s32.totalorder %s29_s16, %s29_s16 }
   0x6   :  { %p471_p0 = scmp.ne.s32.totalorder %s29_s16, %s470_s17  ;;  %p476_p2 = scmp.lt.s32.totalorder %s470_s17, %s470_s17 }
   0x8   :  { %p477_p3 = por %p476_p2, %p475_p1 }
   0xa   :  { %p478_p4 = pnand %p477_p3, %p471_p0 }
   0xc   :  { %481 = shalt.err (!%p478_p4)
}
   0xd   :  { %s571_s18 = smov 512   ;;  %s572_s19 = smov 32  }
   0xe   :  { %34 = dma.hbm_to_vmem [thread:$0]  %s650_s1, 2048, %s29_s16, [#allocation6], %s571_s18, %s571_s18, %s572_s19  }
   0xf   :  { %s573_s22 = smov [#allocation2]   ;;  %s574_s24 = smov [#allocation7]  }
  0x10   :  { %s19_s23 = sshll.u32 %s573_s22, 4  ;;  %s41_s25 = sshll.u32 %s574_s24, 4  ;;  %s20_s23 = int_to_ptr.vmem [resolvable:$true] %s19_s23  ;;  %s42_s25 = int_to_ptr.vmem [resolvable:$true] %s41_s25 }
  0x11   :  { %s490_s26 = scalar_lea.vmem %s20_s23, 32  ;;  %p495_p6 = scmp.lt.s32.totalorder %s20_s23, %s20_s23 }
  0x12   :  { %p491_p5 = scmp.ne.s32.totalorder %s20_s23, %s490_s26  ;;  %p496_p7 = scmp.lt.s32.totalorder %s490_s26, %s490_s26 }
  0x14   :  { %p497_p8 = por %p496_p7, %p495_p6 }
  0x16   :  { %p498_p9 = pnand %p497_p8, %p491_p5 }
  0x18   :  { %501 = shalt.err (!%p498_p9)
}
  0x19   :  { %22 = dma.hbm_to_vmem [thread:$0]  %s649_s0, 32, %s20_s23, [#allocation3]  }
  0x1a   :  { %s510_s29 = scalar_lea.vmem %s42_s25, 64  ;;  %p515_p11 = scmp.lt.s32.totalorder %s42_s25, %s42_s25 }
  0x1b   :  { %p511_p10 = scmp.ne.s32.totalorder %s42_s25, %s510_s29  ;;  %p516_p12 = scmp.lt.s32.totalorder %s510_s29, %s510_s29 }
  0x1d   :  { %p517_p13 = por %p516_p12, %p515_p11 }
  0x1f   :  { %p518_p0 = pnand %p517_p13, %p511_p10 }
  0x21   :  { %521 = shalt.err (!%p518_p0)
}
  0x22   :  { %44 = dma.hbm_to_vmem [thread:$0]  %s651_s2, 64, %s42_s25, [#allocation6]  }
  0x23   :  { %s575_s5 = smov [#allocation8]  }
  0x24   :  { %s51_s6 = sshll.u32 %s575_s5, 4  ;;  %s52_s6 = int_to_ptr.vmem [resolvable:$true] %s51_s6 }
  0x25   :  { %s530_s7 = scalar_lea.vmem %s52_s6, 128  ;;  %p535_p2 = scmp.lt.s32.totalorder %s52_s6, %s52_s6 }
  0x26   :  { %p531_p1 = scmp.ne.s32.totalorder %s52_s6, %s530_s7  ;;  %p536_p3 = scmp.lt.s32.totalorder %s530_s7, %s530_s7 }
  0x28   :  { %p537_p4 = por %p536_p3, %p535_p2 }
  0x2a   :  { %p538_p5 = pnand %p537_p4, %p531_p1 }
  0x2c   :  { %541 = shalt.err (!%p538_p5)
}
  0x2d   :  { %54 = dma.hbm_to_vmem [thread:$0]  %s652_s3, 128, %s52_s6, [#allocation9]  }
  0x2e   :  { %562 = dma.done.wait [#allocation3], 32  }
  0x2f   :  { %563 = vsyncadd [#allocation3], 4294967264 }
  0x30   :  { %564 = dma.done.wait [#allocation6], 2112  }
  0x31   :  { %565 = vsyncadd [#allocation6], 4294965184 }
  0x32   :  { %566 = dma.done.wait [#allocation9], 128  }
  0x33   :  { %567 = vsyncadd [#allocation9], 4294967168  ;;  %v576_v0 = vmov 0.0   ;;  %v81_v1 = vld [vmem:[#allocation5 + $0x68] sm:$0xff]  ;;  %v80_v2 = vld [vmem:[#allocation5 + $0x60] sm:$0xff]  ;;  %vm106_vm0 = vcmask 261120   ;;  %v86_v18 = vlaneseq }
  0x34   :  { %174 = vmatprep.mubr.f32.mxu0 %v576_v0  ;;  %245 = vmatprep.mubr.f32.mxu1 %v576_v0  ;;  %v77_v3 = vld [vmem:[#allocation5 + $0x48] sm:$0xff]  ;;  %v83_v4 = vld [vmem:[#allocation5 + $0x78] sm:$0xff]  ;;  %v76_v5 = vld [vmem:[#allocation5 + $0x40] sm:$0xff]  ;;  %v577_v20 = vmov 1966171168   ;;  %vm277_vm1 = vcmask 516096  }
  0x35   :  { %134 = vmatprep.subr.mxu0 %v81_v1  ;;  %v82_v6 = vld [vmem:[#allocation5 + $0x70] sm:$0xff]  ;;  %205 = vmatprep.subr.mxu1 %v83_v4  ;;  %v73_v7 = vld [vmem:[#allocation5 + $0x28] sm:$0xff]  ;;  %v79_v8 = vld [vmem:[#allocation5 + $0x58] sm:$0xff]  ;;  %v87_v19 = vshrl.u32 %v86_v18, 7  ;;  %v254_v21 = vunpack.c.l.s4 %v577_v20  ;;  %s578_s2 = smov 64   ;;  %vm426_vm2 = vcmask 523264  }
  0x36   :  { %135 = vmatpush1.msra.mxu0 %v80_v2  ;;  %206 = vmatpush1.msra.mxu1 %v82_v6  ;;  %v72_v9 = vld [vmem:[#allocation5 + $0x20] sm:$0xff]  ;;  %v78_v10 = vld [vmem:[#allocation5 + $0x50] sm:$0xff]  ;;  %v75_v11 = vld [vmem:[#allocation5 + $0x38] sm:$0xff]  ;;  %s579_s3 = smov [#allocation10]  }
  0x37   :  { %136 = vmatprep.subr.mxu0 %v77_v3  ;;  %207 = vmatprep.subr.mxu1 %v79_v8  ;;  %v69_v12 = vld [vmem:[#allocation5 + $0x8] sm:$0xff]  ;;  %v74_v13 = vld [vmem:[#allocation5 + $0x30] sm:$0xff]  ;;  %v68_v14 = vld [vmem:[#allocation5] sm:$0xff]  ;;  %v619_v22 = vsub.s32 0, %v87_v19  ;;  %v96_v24 = vsub.s32 2, %v87_v19  ;;  %v255_v25 = vunpack.c.0.s8 %v254_v21  ;;  %v92_v26 = vsub.s32 1, %v87_v19 }
  0x38   :  { %137 = vmatpush1.msra.mxu0 %v76_v5  ;;  %208 = vmatpush1.msra.mxu1 %v78_v10  ;;  %v71_v15 = vld [vmem:[#allocation5 + $0x18] sm:$0xff]  ;;  %v70_v17 = vld [vmem:[#allocation5 + $0x10] sm:$0xff]  ;;  %v84_v23 = vld [vmem:[#allocation7] sm:$0xf]  ;;  %v100_v27 = vsub.s32 3, %v87_v19  ;;  %s434_s9 = sshll.u32 %s579_s3, 4  ;;  %s435_s9 = int_to_ptr.vmem [resolvable:$true] %s434_s9 }
  0x39   :  { %138 = vmatprep.subr.mxu0 %v73_v7  ;;  %209 = vmatprep.subr.mxu1 %v75_v11  ;;  %v67_v16 = vld [vmem:[#allocation2] sm:$0x3]  ;;  %v89_v28 = vrot.slane %v84_v23, %v619_v22  ;;  %v97_v29 = vrot.slane %v84_v23, %v96_v24  ;;  %v258_v30 = vsub.s32 %v255_v25, %v87_v19  ;;  %v425_v59 = vld [vmem:[#allocation8] sm:$0xff]  ;;  %s542_s10 = scalar_lea.vmem %s435_s9, 512  ;;  %p547_p7 = scmp.lt.s32.totalorder %s435_s9, %s435_s9 }
  0x3a   :  { %139 = vmatpush1.msra.mxu0 %v72_v9  ;;  %210 = vmatpush1.msra.mxu1 %v74_v13  ;;  %v93_v31 = vrot.slane %v84_v23, %v92_v26  ;;  %v101_v33 = vrot.slane %v84_v23, %v100_v27  ;;  %427 = vst.msk [vmem:[#allocation10 + $0x8] sm:$0xff] %vm426_vm2, %v425_v59  ;;  %428 = vst.msk [vmem:[#allocation10 + $0x18] sm:$0xff] %vm426_vm2, %v425_v59  ;;  %p543_p6 = scmp.ne.s32.totalorder %s435_s9, %s542_s10  ;;  %p548_p8 = scmp.lt.s32.totalorder %s542_s10, %s542_s10 }
  0x3b   :  { %140 = vmatprep.subr.mxu0 %v69_v12  ;;  %211 = vmatprep.subr.mxu1 %v71_v15 }
  0x3c   :  { %141 = vmatpush1.msra.mxu0 %v68_v14  ;;  %212 = vmatpush1.msra.mxu1 %v70_v17  ;;  %p549_p9 = por %p548_p8, %p547_p7 }
  0x3d   :  { %448 = vmatmul.mubr.msk.f32.vlgmr.msra.gmra.mxu0 %vm106_vm0, %v67_v16  ;;  %449 = vmatmul.mubr.msk.f32.vlgmr.msra.gmra.mxu1 %vm106_vm0, %v67_v16 }
  0x3e   :  { %p550_p10 = pnand %p549_p9, %p543_p6 }
  0xfd   :  { %v176_v32 = vpop.f32.mrf.mxu0  ;;  %v247_v35 = vpop.f32.mrf.mxu1 }
  0xfe   :  { %v177_v34 = vadd.f32 %v176_v32, %v89_v28  ;;  %v248_v37 = vadd.f32 %v247_v35, %v97_v29 }
  0xff   :  { %v178_v36 = vpop.f32.mrf.mxu0  ;;  %v249_v40 = vpop.f32.mrf.mxu1 }
 0x100   :  { %v259_v38 = vrot.slane %v177_v34, %v258_v30  ;;  %v179_v39 = vadd.f32 %v178_v36, %v93_v31  ;;  %v346_v41 = vrot.slane %v248_v37, %v258_v30  ;;  %v250_v42 = vadd.f32 %v249_v40, %v101_v33 }
 0x102   :  { %v260_v43 = vcombine.high %v259_v38, %v259_v38  ;;  %v303_v44 = vrot.slane %v179_v39, %v258_v30  ;;  %v267_v45 = vrot.slane %v259_v38, %v258_v30  ;;  %v347_v46 = vcombine.high %v346_v41, %v346_v41 }
 0x103   :  { %v354_v47 = vrot.slane %v346_v41, %v258_v30  ;;  %v389_v48 = vrot.slane %v250_v42, %v258_v30 }
 0x104   :  { %v304_v49 = vcombine.high %v303_v44, %v303_v44  ;;  %v283_v50 = vrot.slane %v267_v45, %v619_v22  ;;  %278 = vst.msk [vmem:[#allocation10] sm:$0x1] %vm277_vm1, %v267_v45  ;;  %v311_v51 = vrot.slane %v303_v44, %v258_v30  ;;  %v274_v52 = vrot.slane %v260_v43, %v258_v30 }
 0x105   :  { %364 = vst.msk [vmem:[#allocation10 + $0x4] sm:$0x1] %vm277_vm1, %v354_v47  ;;  %v390_v53 = vcombine.high %v389_v48, %v389_v48  ;;  %v397_v54 = vrot.slane %v389_v48, %v258_v30  ;;  %v361_v55 = vrot.slane %v347_v46, %v258_v30  ;;  %v369_v57 = vrot.slane %v354_v47, %v619_v22 }
 0x106   :  { %288 = vrot.lane.b32.xlu0 %v283_v50, %s578_s2  ;;  %v326_v56 = vrot.slane %v311_v51, %v619_v22  ;;  %321 = vst.msk [vmem:[#allocation10 + $0x2] sm:$0x1] %vm277_vm1, %v311_v51  ;;  %279 = vst.msk [vmem:[#allocation10 + $0x10] sm:$0x1] %vm277_vm1, %v274_v52  ;;  %v318_v58 = vrot.slane %v304_v49, %v258_v30  ;;  %v287_v62 = vrot.slane %v274_v52, %v619_v22 }
 0x107   :  { %407 = vst.msk [vmem:[#allocation10 + $0x6] sm:$0x1] %vm277_vm1, %v397_v54  ;;  %365 = vst.msk [vmem:[#allocation10 + $0x14] sm:$0x1] %vm277_vm1, %v361_v55  ;;  %v404_v60 = vrot.slane %v390_v53, %v258_v30  ;;  %v373_v61 = vrot.slane %v361_v55, %v619_v22  ;;  %v412_v0 = vrot.slane %v397_v54, %v619_v22 }
 0x108   :  { %331 = vrot.lane.b32.xlu1 %v326_v56, %s578_s2  ;;  %322 = vst.msk [vmem:[#allocation10 + $0x12] sm:$0x1] %vm277_vm1, %v318_v58  ;;  %v330_v63 = vrot.slane %v318_v58, %v619_v22 }
 0x109   :  { %408 = vst.msk [vmem:[#allocation10 + $0x16] sm:$0x1] %vm277_vm1, %v404_v60  ;;  %v416_v1 = vrot.slane %v404_v60, %v619_v22 }
 0x10a   :  { %374 = vrot.lane.b32.xlu0 %v369_v57, %s578_s2 }
 0x10c   :  { %376 = vrot.lane.b32.xlu1 %v373_v61, %s578_s2 }
 0x10e   :  { %290 = vrot.lane.b32.xlu0 %v287_v62, %s578_s2 }
 0x110   :  { %333 = vrot.lane.b32.xlu1 %v330_v63, %s578_s2 }
 0x112   :  { %417 = vrot.lane.b32.xlu0 %v412_v0, %s578_s2 }
 0x114   :  { %419 = vrot.lane.b32.xlu1 %v416_v1, %s578_s2 }
 0x178   :  { %v289_v2 = vpop.permute.xlu0 %288 }
 0x179   :  { %294 = vst.msk [vmem:[#allocation10 + $0x1] sm:$0x1] %vm277_vm1, %v289_v2 }
 0x17a   :  { %v332_v3 = vpop.permute.xlu1 %331 }
 0x17b   :  { %337 = vst.msk [vmem:[#allocation10 + $0x3] sm:$0x1] %vm277_vm1, %v332_v3 }
 0x17c   :  { %v375_v4 = vpop.permute.xlu0 %374 }
 0x17d   :  { %380 = vst.msk [vmem:[#allocation10 + $0x5] sm:$0x1] %vm277_vm1, %v375_v4 }
 0x17e   :  { %v377_v5 = vpop.permute.xlu1 %376 }
 0x17f   :  { %381 = vst.msk [vmem:[#allocation10 + $0x15] sm:$0x1] %vm277_vm1, %v377_v5 }
 0x180   :  { %v291_v6 = vpop.permute.xlu0 %290 }
 0x181   :  { %295 = vst.msk [vmem:[#allocation10 + $0x11] sm:$0x1] %vm277_vm1, %v291_v6 }
 0x182   :  { %v334_v7 = vpop.permute.xlu1 %333 }
 0x183   :  { %338 = vst.msk [vmem:[#allocation10 + $0x13] sm:$0x1] %vm277_vm1, %v334_v7 }
 0x184   :  { %v418_v8 = vpop.permute.xlu0 %417 }
 0x185   :  { %423 = vst.msk [vmem:[#allocation10 + $0x7] sm:$0x1] %vm277_vm1, %v418_v8 }
 0x186   :  { %v420_v9 = vpop.permute.xlu1 %419 }
 0x187   :  { %424 = vst.msk [vmem:[#allocation10 + $0x17] sm:$0x1] %vm277_vm1, %v420_v9 }
 0x188   :  { %553 = shalt.err (!%p550_p10)
}
 0x189   :  { %s580_s11 = smov 128   ;;  %s581_s12 = smov 8  }
 0x18a   :  { %440 = dma.vmem_to_hbm [thread:$0]  %s435_s9, 512, %s653_s4, [#allocation4], %s580_s11, %s580_s11, %s581_s12  }
 0x18b   :  { %568 = dma.done.wait [#allocation4], 512  }
 0x18c   :  { %569 = vsyncadd [#allocation4], 4294966784 }
 0x18d   :  { %444 = vsyncpa [#allocation3], 1 }
 0x18e   :  { %445 = vsyncpa [#allocation6], 1 }
 0x18f   :  { %446 = vsyncpa [#allocation9], 1 }
 0x190   :  { %447 = vsyncpa [#allocation4], 1 }

</bundles_post_ra>
